<compile_context>
chip_gen: v5e
topology: v5e:2x2
jax: 0.10.0
libtpu: 0.0.40
codegen_flags: <defaults>
</compile_context>

<pallas_src>
import functools

import jax
import jax.numpy as jnp
from jax.experimental import pallas as pl
from jax.experimental.pallas import tpu as pltpu


def _qnet_kernel(x_ref, w1_ref, b1_ref, w2_ref, b2_ref, o_ref):
    # Layer 1: h = relu(x @ W1 + b1)  — bf16 MXU matmul, f32 accumulate.
    h = jnp.dot(x_ref[...], w1_ref[...], preferred_element_type=jnp.float32)
    h = jnp.maximum(h + b1_ref[...], 0.0)                       # f32 VPU
    # Layer 2: out = h @ W2 + b2 — N is padded to 128 so stores are lane-dense.
    out = jnp.dot(h.astype(w2_ref.dtype), w2_ref[...],
                  preferred_element_type=jnp.float32)
    o_ref[...] = (out + b2_ref[...]).astype(o_ref.dtype)


def _round_up(x: int, m: int) -> int:
    return ((x + m - 1) // m) * m


@functools.partial(jax.jit, static_argnames=("block_b",))
def linear_qnet_forward(x, w1, b1, w2, b2, *, block_b: int = 256):
    """Forward pass of Linear_QNet.

    x: (B, in), w1: (in, hidden), b1: (1, hidden), w2: (hidden, out),
    b2: (1, out) -> (B, out) float32.  Weights are stored pre-transposed
    ((in_features, out_features)) relative to PyTorch's (out, in) layout.
    """
    B, in_size = x.shape
    hidden = w1.shape[1]
    out_size = w2.shape[1]

    b1 = b1.reshape(1, hidden).astype(jnp.float32)
    b2 = b2.reshape(1, out_size).astype(jnp.float32)

    LANE, SUBLANE = 128, 8

    # Pad feature dims to lane multiples (lane-dense loads/stores), batch to a
    # sublane-multiple tile.
    in_p = _round_up(in_size, LANE)
    hid_p = _round_up(hidden, LANE)
    out_p = _round_up(out_size, LANE)

    tb = min(block_b, _round_up(B, SUBLANE))      # batch tile, multiple of 8
    b_pad = _round_up(B, tb)

    xp = jnp.zeros((b_pad, in_p), jnp.bfloat16).at[:B, :in_size].set(
        x.astype(jnp.bfloat16))
    w1p = jnp.zeros((in_p, hid_p), jnp.bfloat16).at[:in_size, :hidden].set(
        w1.astype(jnp.bfloat16))
    b1p = jnp.zeros((1, hid_p), jnp.float32).at[:, :hidden].set(b1)
    w2p = jnp.zeros((hid_p, out_p), jnp.bfloat16).at[:hidden, :out_size].set(
        w2.astype(jnp.bfloat16))
    b2p = jnp.zeros((1, out_p), jnp.float32).at[:, :out_size].set(b2)

    out_padded = pl.pallas_call(
        _qnet_kernel,
        out_shape=jax.ShapeDtypeStruct((b_pad, out_p), jnp.float32),
        grid=(b_pad // tb,),
        in_specs=[
            pl.BlockSpec((tb, in_p), lambda i: (i, 0)),       # x tile (pipelined)
            pl.BlockSpec((in_p, hid_p), lambda i: (0, 0)),    # W1 (VMEM-resident)
            pl.BlockSpec((1, hid_p), lambda i: (0, 0)),       # b1
            pl.BlockSpec((hid_p, out_p), lambda i: (0, 0)),   # W2
            pl.BlockSpec((1, out_p), lambda i: (0, 0)),       # b2
        ],
        out_specs=pl.BlockSpec((tb, out_p), lambda i: (i, 0)),
        compiler_params=pltpu.CompilerParams(
            dimension_semantics=("parallel",),                # v7x: both TCs
        ),
    )(xp, w1p, b1p, w2p, b2p)

    return out_padded[:B, :out_size]


def init_params(key, input_size, hidden_size, output_size):
    """Deterministic init matching PyTorch nn.Linear's U(-1/sqrt(fan_in), +)."""
    k1, k2, k3, k4 = jax.random.split(key, 4)
    bound1 = 1.0 / jnp.sqrt(input_size)
    bound2 = 1.0 / jnp.sqrt(hidden_size)
    # Stored as (in_features, out_features) = PyTorch weight transposed.
    w1 = jax.random.uniform(k1, (input_size, hidden_size), jnp.float32,
                            -bound1, bound1)
    b1 = jax.random.uniform(k2, (1, hidden_size), jnp.float32, -bound1, bound1)
    w2 = jax.random.uniform(k3, (hidden_size, output_size), jnp.float32,
                            -bound2, bound2)
    b2 = jax.random.uniform(k4, (1, output_size), jnp.float32, -bound2, bound2)
    return w1, b1, w2, b2


if __name__ == "__main__":
    # Snake-game QNet shapes: input=11, hidden=256, output=3. Batched (B=64) so
    # the kernel has real MXU work per launch, per the perf review.
    batch, input_size, hidden_size, output_size = 64, 11, 256, 3

    key = jax.random.PRNGKey(0)
    kx, kp = jax.random.split(key)
    x = jax.random.normal(kx, (batch, input_size), jnp.float32)
    w1, b1, w2, b2 = init_params(kp, input_size, hidden_size, output_size)

    out = linear_qnet_forward(x, w1, b1, w2, b2)
    jax.block_until_ready(out)
    assert out.shape == (batch, output_size)

    # Reference 1: bf16-matched math (same rounding path as the kernel).
    xb, w1b, w2b = (x.astype(jnp.bfloat16), w1.astype(jnp.bfloat16),
                    w2.astype(jnp.bfloat16))
    h_ref = jnp.maximum(
        jnp.dot(xb, w1b, preferred_element_type=jnp.float32) + b1, 0.0)
    ref_bf16 = jnp.dot(h_ref.astype(jnp.bfloat16), w2b,
                       preferred_element_type=jnp.float32) + b2
    assert jnp.allclose(out, ref_bf16, atol=1e-3, rtol=1e-3)

    # Reference 2: full-f32 PyTorch-equivalent math, bf16-sized tolerance.
    ref_f32 = jnp.maximum(x @ w1 + b1, 0.0) @ w2 + b2
    assert jnp.allclose(out, ref_f32, atol=5e-2, rtol=5e-2)

    print("KERNEL_OK")
</pallas_src>

<mosaic_0001>
module attributes {stable_mosaic.version = 11 : i64} {
  func.func @_qnet_kernel(%arg0: i32, %arg1: memref<64x128xbf16, #tpu.memory_space<vmem>>, %arg2: memref<128x256xbf16, #tpu.memory_space<vmem>>, %arg3: memref<1x256xf32, #tpu.memory_space<vmem>>, %arg4: memref<256x128xbf16, #tpu.memory_space<vmem>>, %arg5: memref<1x128xf32, #tpu.memory_space<vmem>>, %arg6: memref<64x128xf32, #tpu.memory_space<vmem>>) attributes {dimension_semantics = [#tpu.dimension_semantics<parallel>], iteration_bounds = array<i64: 1>, scalar_prefetch = 0 : i64, scratch_operands = 0 : i64, tpu.core_type = #tpu.core_type<tc>, window_params = [{transform_indices = @transform_0, window_bounds = array<i64: 64, 128>}, {pipeline_mode = #tpu.pipeline_mode<synchronous>, transform_indices = @transform_1, window_bounds = array<i64: 128, 256>}, {pipeline_mode = #tpu.pipeline_mode<synchronous>, transform_indices = @transform_2, window_bounds = array<i64: 1, 256>}, {pipeline_mode = #tpu.pipeline_mode<synchronous>, transform_indices = @transform_3, window_bounds = array<i64: 256, 128>}, {pipeline_mode = #tpu.pipeline_mode<synchronous>, transform_indices = @transform_4, window_bounds = array<i64: 1, 128>}, {transform_indices = @transform_5, window_bounds = array<i64: 64, 128>}]} {
    %c0 = arith.constant 0 : index
    %c0_0 = arith.constant 0 : index
    %0 = vector.load %arg1[%c0, %c0_0] : memref<64x128xbf16, #tpu.memory_space<vmem>>, vector<64x128xbf16>
    %c0_1 = arith.constant 0 : index
    %c0_2 = arith.constant 0 : index
    %1 = vector.load %arg2[%c0_1, %c0_2] : memref<128x256xbf16, #tpu.memory_space<vmem>>, vector<128x256xbf16>
    %cst = arith.constant dense<0.000000e+00> : vector<64x256xf32>
    %2 = tpu.matmul %0, %1, %cst {dimension_numbers = #tpu.dot_dimension_numbers<[1], [0], [0], [1], [0, 0, 1, 1], [], []>} : vector<64x128xbf16>, vector<128x256xbf16>, vector<64x256xf32> -> vector<64x256xf32>
    %c0_3 = arith.constant 0 : index
    %c0_4 = arith.constant 0 : index
    %3 = vector.load %arg3[%c0_3, %c0_4] : memref<1x256xf32, #tpu.memory_space<vmem>>, vector<1x256xf32>
    %4 = vector.broadcast %3 : vector<1x256xf32> to vector<64x256xf32>
    %5 = arith.addf %2, %4 : vector<64x256xf32>
    %cst_5 = arith.constant 0.000000e+00 : f32
    %6 = vector.broadcast %cst_5 : f32 to vector<64x256xf32>
    %7 = arith.maximumf %5, %6 : vector<64x256xf32>
    %8 = arith.truncf %7 : vector<64x256xf32> to vector<64x256xbf16>
    %c0_6 = arith.constant 0 : index
    %c0_7 = arith.constant 0 : index
    %9 = vector.load %arg4[%c0_6, %c0_7] : memref<256x128xbf16, #tpu.memory_space<vmem>>, vector<256x128xbf16>
    %cst_8 = arith.constant dense<0.000000e+00> : vector<64x128xf32>
    %10 = tpu.matmul %8, %9, %cst_8 {dimension_numbers = #tpu.dot_dimension_numbers<[1], [0], [0], [1], [0, 0, 1, 1], [], []>} : vector<64x256xbf16>, vector<256x128xbf16>, vector<64x128xf32> -> vector<64x128xf32>
    %c0_9 = arith.constant 0 : index
    %c0_10 = arith.constant 0 : index
    %11 = vector.load %arg5[%c0_9, %c0_10] : memref<1x128xf32, #tpu.memory_space<vmem>>, vector<1x128xf32>
    %12 = vector.broadcast %11 : vector<1x128xf32> to vector<64x128xf32>
    %13 = arith.addf %10, %12 : vector<64x128xf32>
    %c0_11 = arith.constant 0 : index
    %c0_12 = arith.constant 0 : index
    %14 = vector.load %arg6[%c0_11, %c0_12] : memref<64x128xf32, #tpu.memory_space<vmem>>, vector<64x128xf32>
    tpu.vector_store %arg6[%c0_11, %c0_12], %13 {strides = array<i32>} : memref<64x128xf32, #tpu.memory_space<vmem>>, vector<64x128xf32>,
    return
  }
  func.func @transform_0(%arg0: i32) -> (i32, i32) {
    %c0_i32 = arith.constant 0 : i32
    %c0_i32_0 = arith.constant 0 : i32
    return %arg0, %c0_i32 : i32, i32
  }
  func.func @transform_1(%arg0: i32) -> (i32, i32) {
    %c0_i32 = arith.constant 0 : i32
    %c0_i32_0 = arith.constant 0 : i32
    %c0_i32_1 = arith.constant 0 : i32
    return %c0_i32, %c0_i32_0 : i32, i32
  }
  func.func @transform_2(%arg0: i32) -> (i32, i32) {
    %c0_i32 = arith.constant 0 : i32
    %c0_i32_0 = arith.constant 0 : i32
    %c0_i32_1 = arith.constant 0 : i32
    return %c0_i32, %c0_i32_0 : i32, i32
  }
  func.func @transform_3(%arg0: i32) -> (i32, i32) {
    %c0_i32 = arith.constant 0 : i32
    %c0_i32_0 = arith.constant 0 : i32
    %c0_i32_1 = arith.constant 0 : i32
    return %c0_i32, %c0_i32_0 : i32, i32
  }
  func.func @transform_4(%arg0: i32) -> (i32, i32) {
    %c0_i32 = arith.constant 0 : i32
    %c0_i32_0 = arith.constant 0 : i32
    %c0_i32_1 = arith.constant 0 : i32
    return %c0_i32, %c0_i32_0 : i32, i32
  }
  func.func @transform_5(%arg0: i32) -> (i32, i32) {
    %c0_i32 = arith.constant 0 : i32
    %c0_i32_0 = arith.constant 0 : i32
    return %arg0, %c0_i32 : i32, i32
  }
}

</mosaic_0001>

<bundles_post_ra>
// kernel: linear_qnet_forward.1
= control target key start
LH: loop header
LB: loop body
LE: loop exit
PB: predicated region body
PF: predicated region fallthrough
CT: control target
= control target key end

     0   :  { %s835_s1 = inlined_call_operand.vmem [shape: bf16[128,256], index: 1, kind: input, shape index: {}]   ;;  %s836_s0 = inlined_call_operand.vmem [shape: bf16[64,128], index: 0, kind: input, shape index: {}]   ;;  %s837_s3 = inlined_call_operand.vmem [shape: bf16[256,128], index: 3, kind: input, shape index: {}]   ;;  %s838_s4 = inlined_call_operand.vmem [shape: f32[1,128], index: 4, kind: input, shape index: {}]   ;;  %s839_s2 = inlined_call_operand.vmem [shape: f32[1,256], index: 2, kind: input, shape index: {}]   ;;  %s840_s5 = inlined_call_operand.vmem [shape: f32[64,128], index: 5, kind: output, shape index: {}]  }
   0x1   :  { %v512_v0 = vld [vmem:[%s835_s1 + $0x70] sm:$0xf]  ;;  %v601_v1 = vld [vmem:[%s835_s1 + $0x74] sm:$0xf0]  ;;  %v600_v2 = vld [vmem:[%s835_s1 + $0x74] sm:$0xf] }
   0x2   :  { %v513_v3 = vor.u32 %v601_v1, %v512_v0  ;;  %v514_v4 = vld [vmem:[%s835_s1 + $0x78] sm:$0xf0]  ;;  %v504_v5 = vld [vmem:[%s835_s1 + $0x60] sm:$0xf]  ;;  %v599_v6 = vld [vmem:[%s835_s1 + $0x64] sm:$0xf0] }
   0x3   :  { %v517_v7 = vor.u32 %v600_v2, %v514_v4  ;;  %v598_v8 = vld [vmem:[%s835_s1 + $0x64] sm:$0xf]  ;;  %v506_v9 = vld [vmem:[%s835_s1 + $0x68] sm:$0xf0]  ;;  %v505_v10 = vor.u32 %v599_v6, %v504_v5  ;;  %v496_v12 = vld [vmem:[%s835_s1 + $0x50] sm:$0xf] }
   0x4   :  { %154 = vmatpush.bf16.msra.mxu0 %v513_v3  ;;  %v509_v11 = vor.u32 %v598_v8, %v506_v9  ;;  %v597_v13 = vld [vmem:[%s835_s1 + $0x54] sm:$0xf0]  ;;  %v596_v14 = vld [vmem:[%s835_s1 + $0x54] sm:$0xf]  ;;  %v498_v15 = vld [vmem:[%s835_s1 + $0x58] sm:$0xf0] }
   0x5   :  { %183 = vmatpush.bf16.msra.mxu1 %v517_v7  ;;  %v497_v16 = vor.u32 %v597_v13, %v496_v12  ;;  %v501_v17 = vor.u32 %v596_v14, %v498_v15  ;;  %v488_v18 = vld [vmem:[%s835_s1 + $0x40] sm:$0xf]  ;;  %v595_v19 = vld [vmem:[%s835_s1 + $0x44] sm:$0xf0]  ;;  %v594_v20 = vld [vmem:[%s835_s1 + $0x44] sm:$0xf] }
   0x6   :  { %v490_v21 = vld [vmem:[%s835_s1 + $0x48] sm:$0xf0]  ;;  %v489_v22 = vor.u32 %v595_v19, %v488_v18  ;;  %v480_v24 = vld [vmem:[%s835_s1 + $0x30] sm:$0xf]  ;;  %v593_v25 = vld [vmem:[%s835_s1 + $0x34] sm:$0xf0] }
   0x7   :  { %v493_v23 = vor.u32 %v594_v20, %v490_v21  ;;  %v592_v26 = vld [vmem:[%s835_s1 + $0x34] sm:$0xf]  ;;  %v482_v27 = vld [vmem:[%s835_s1 + $0x38] sm:$0xf0]  ;;  %v481_v28 = vor.u32 %v593_v25, %v480_v24  ;;  %v472_v30 = vld [vmem:[%s835_s1 + $0x20] sm:$0xf] }
   0x8   :  { %155 = vmatpush.bf16.msra.mxu0 %v505_v10  ;;  %v485_v29 = vor.u32 %v592_v26, %v482_v27  ;;  %v591_v31 = vld [vmem:[%s835_s1 + $0x24] sm:$0xf0]  ;;  %v590_v32 = vld [vmem:[%s835_s1 + $0x24] sm:$0xf]  ;;  %v474_v33 = vld [vmem:[%s835_s1 + $0x28] sm:$0xf0] }
   0x9   :  { %184 = vmatpush.bf16.msra.mxu1 %v509_v11  ;;  %v473_v34 = vor.u32 %v591_v31, %v472_v30  ;;  %v477_v35 = vor.u32 %v590_v32, %v474_v33  ;;  %v464_v36 = vld [vmem:[%s835_s1 + $0x10] sm:$0xf]  ;;  %v589_v37 = vld [vmem:[%s835_s1 + $0x14] sm:$0xf0]  ;;  %v588_v38 = vld [vmem:[%s835_s1 + $0x14] sm:$0xf] }
   0xa   :  { %v466_v39 = vld [vmem:[%s835_s1 + $0x18] sm:$0xf0]  ;;  %v465_v40 = vor.u32 %v589_v37, %v464_v36  ;;  %v456_v42 = vld [vmem:[%s835_s1] sm:$0xf]  ;;  %v587_v43 = vld [vmem:[%s835_s1 + $0x4] sm:$0xf0] }
   0xb   :  { %v469_v41 = vor.u32 %v588_v38, %v466_v39  ;;  %v586_v44 = vld [vmem:[%s835_s1 + $0x4] sm:$0xf]  ;;  %v458_v45 = vld [vmem:[%s835_s1 + $0x8] sm:$0xf0]  ;;  %v457_v46 = vor.u32 %v587_v43, %v456_v42  ;;  %v609_v50 = vld [vmem:[%s837_s3 + $0x38] sm:$0xff] }
   0xc   :  { %156 = vmatpush.bf16.msra.mxu0 %v497_v16  ;;  %v461_v47 = vor.u32 %v586_v44, %v458_v45  ;;  %v582_v48 = vld [vmem:[%s836_s0] sm:$0xff]  ;;  %v583_v49 = vld [vmem:[%s836_s0 + $0x8] sm:$0xff]  ;;  %v617_v51 = vld [vmem:[%s837_s3 + $0x78] sm:$0xff]  ;;  %368 = vmatpush.bf16.msra.mxu2 %v609_v50 }
   0xd   :  { %185 = vmatpush.bf16.msra.mxu1 %v501_v17  ;;  %397 = vmatpush.bf16.msra.mxu3 %v617_v51  ;;  %v608_v52 = vld [vmem:[%s837_s3 + $0x30] sm:$0xff]  ;;  %v607_v54 = vld [vmem:[%s837_s3 + $0x28] sm:$0xff]  ;;  %v606_v56 = vld [vmem:[%s837_s3 + $0x20] sm:$0xff] }
   0xe   :  { %v616_v53 = vld [vmem:[%s837_s3 + $0x70] sm:$0xff]  ;;  %v615_v55 = vld [vmem:[%s837_s3 + $0x68] sm:$0xff]  ;;  %v614_v57 = vld [vmem:[%s837_s3 + $0x60] sm:$0xff] }
   0xf   :  { %v584_v58 = vld [vmem:[%s836_s0 + $0x10] sm:$0xff]  ;;  %v585_v59 = vld [vmem:[%s836_s0 + $0x18] sm:$0xff]  ;;  %v603_v0 = vld [vmem:[%s837_s3 + $0x8] sm:$0xff] }
  0x10   :  { %157 = vmatpush.bf16.msra.mxu0 %v489_v22  ;;  %369 = vmatpush.bf16.msra.mxu2 %v608_v52  ;;  %v605_v60 = vld [vmem:[%s837_s3 + $0x18] sm:$0xff]  ;;  %v604_v62 = vld [vmem:[%s837_s3 + $0x10] sm:$0xff]  ;;  %v611_v1 = vld [vmem:[%s837_s3 + $0x48] sm:$0xff] }
  0x11   :  { %186 = vmatpush.bf16.msra.mxu1 %v493_v23  ;;  %398 = vmatpush.bf16.msra.mxu3 %v616_v53  ;;  %v613_v61 = vld [vmem:[%s837_s3 + $0x58] sm:$0xff]  ;;  %v612_v63 = vld [vmem:[%s837_s3 + $0x50] sm:$0xff]  ;;  %v602_v2 = vld [vmem:[%s837_s3] sm:$0xff] }
  0x12   :  { %v610_v3 = vld [vmem:[%s837_s3 + $0x40] sm:$0xff] }
  0x13   :  { %v44_v4 = vld [vmem:[%s839_s2] sm:$0x3] }
  0x14   :  { %158 = vmatpush.bf16.msra.mxu0 %v481_v28  ;;  %370 = vmatpush.bf16.msra.mxu2 %v607_v54  ;;  %v46_v7 = vperm.slane %v44_v4, 0  ;;  %v47_v8 = vperm.slane %v44_v4, 1 }
  0x15   :  { %187 = vmatpush.bf16.msra.mxu1 %v485_v29  ;;  %399 = vmatpush.bf16.msra.mxu3 %v615_v55 }
  0x18   :  { %159 = vmatpush.bf16.msra.mxu0 %v473_v34  ;;  %371 = vmatpush.bf16.msra.mxu2 %v606_v56 }
  0x19   :  { %188 = vmatpush.bf16.msra.mxu1 %v477_v35  ;;  %400 = vmatpush.bf16.msra.mxu3 %v614_v57 }
  0x1c   :  { %160 = vmatpush.bf16.msra.mxu0 %v465_v40  ;;  %372 = vmatpush.bf16.msra.mxu2 %v605_v60 }
  0x1d   :  { %189 = vmatpush.bf16.msra.mxu1 %v469_v41  ;;  %401 = vmatpush.bf16.msra.mxu3 %v613_v61 }
  0x20   :  { %161 = vmatpush.bf16.msra.mxu0 %v457_v46  ;;  %373 = vmatpush.bf16.msra.mxu2 %v604_v62 }
  0x21   :  { %190 = vmatpush.bf16.msra.mxu1 %v461_v47  ;;  %402 = vmatpush.bf16.msra.mxu3 %v612_v63  ;;  %v618_v63 = vld [vmem:[%s838_s4] ss:$0 sm:$0xff] }
  0x23   :  { %162 = vmatmul.bf16.vlgmr.msra.gmra.mxu0 %v582_v48 }
  0x24   :  { %191 = vmatmul.bf16.vlgmr.msra.gmra.mxu1 %v582_v48  ;;  %374 = vmatpush.bf16.msra.mxu2 %v603_v0 }
  0x25   :  { %403 = vmatpush.bf16.msra.mxu3 %v611_v1 }
  0x28   :  { %375 = vmatpush.bf16.msra.mxu2 %v602_v2 }
  0x29   :  { %404 = vmatpush.bf16.msra.mxu3 %v610_v3 }
  0x33   :  { %167 = vmatmul.bf16.gmra.mxu0 %v583_v49 }
  0x34   :  { %196 = vmatmul.bf16.gmra.mxu1 %v583_v49 }
  0x43   :  { %172 = vmatmul.bf16.gmra.mxu0 %v584_v58 }
  0x44   :  { %201 = vmatmul.bf16.gmra.mxu1 %v584_v58 }
  0x53   :  { %177 = vmatmul.bf16.gmra.mxu0 %v585_v59 }
  0x54   :  { %206 = vmatmul.bf16.gmra.mxu1 %v585_v59 }
  0xa0   :  { %v163_v5 = vpop.f32.mrf.mxu0 }
  0xa1   :  { %v192_v6 = vpop.f32.mrf.mxu1  ;;  %v164_v9 = vadd.f32 %v163_v5, %v46_v7 }
  0xa2   :  { %v193_v10 = vadd.f32 %v192_v6, %v47_v8 }
  0xa3   :  { %v212_v15 = vmax.f32 %v164_v9, 0.0 }
  0xa4   :  { %v213_v17 = vmax.f32 %v193_v10, 0.0 }
  0xa8   :  { %v165_v11 = vpop.f32.mrf.mxu0 }
  0xa9   :  { %v166_v12 = vadd.f32 %v165_v11, %v46_v7  ;;  %v194_v13 = vpop.f32.mrf.mxu1 }
  0xaa   :  { %v195_v14 = vadd.f32 %v194_v13, %v47_v8 }
  0xab   :  { %v214_v16 = vmax.f32 %v166_v12, 0.0 }
  0xac   :  { %v215_v18 = vmax.f32 %v195_v14, 0.0 }
  0xad   :  { %v228_v19 = vpack.c.bf16 %v214_v16, %v212_v15 }
  0xae   :  { %v229_v20 = vpack.c.bf16 %v215_v18, %v213_v17 }
  0xaf   :  { %376 = vmatmul.bf16.vlgmr.msra.gmra.mxu2 %v228_v19 }
  0xb0   :  { %405 = vmatmul.bf16.vlgmr.msra.gmra.mxu3 %v229_v20  ;;  %v168_v21 = vpop.f32.mrf.mxu0 }
  0xb1   :  { %v197_v22 = vpop.f32.mrf.mxu1  ;;  %v169_v23 = vadd.f32 %v168_v21, %v46_v7 }
  0xb2   :  { %v198_v24 = vadd.f32 %v197_v22, %v47_v8 }
  0xb3   :  { %v216_v29 = vmax.f32 %v169_v23, 0.0 }
  0xb4   :  { %v217_v31 = vmax.f32 %v198_v24, 0.0 }
  0xb8   :  { %v170_v25 = vpop.f32.mrf.mxu0 }
  0xb9   :  { %v171_v26 = vadd.f32 %v170_v25, %v46_v7  ;;  %v199_v27 = vpop.f32.mrf.mxu1 }
  0xba   :  { %v200_v28 = vadd.f32 %v199_v27, %v47_v8 }
  0xbb   :  { %v218_v30 = vmax.f32 %v171_v26, 0.0 }
  0xbc   :  { %v219_v32 = vmax.f32 %v200_v28, 0.0 }
  0xbd   :  { %v230_v33 = vpack.c.bf16 %v218_v30, %v216_v29 }
  0xbe   :  { %v231_v34 = vpack.c.bf16 %v219_v32, %v217_v31 }
  0xbf   :  { %381 = vmatmul.bf16.gmra.mxu2 %v230_v33 }
  0xc0   :  { %410 = vmatmul.bf16.gmra.mxu3 %v231_v34  ;;  %v173_v35 = vpop.f32.mrf.mxu0 }
  0xc1   :  { %v202_v36 = vpop.f32.mrf.mxu1  ;;  %v174_v37 = vadd.f32 %v173_v35, %v46_v7 }
  0xc2   :  { %v203_v38 = vadd.f32 %v202_v36, %v47_v8 }
  0xc3   :  { %v220_v43 = vmax.f32 %v174_v37, 0.0 }
  0xc4   :  { %v221_v45 = vmax.f32 %v203_v38, 0.0 }
  0xc8   :  { %v175_v39 = vpop.f32.mrf.mxu0 }
  0xc9   :  { %v176_v40 = vadd.f32 %v175_v39, %v46_v7  ;;  %v204_v41 = vpop.f32.mrf.mxu1 }
  0xca   :  { %v205_v42 = vadd.f32 %v204_v41, %v47_v8 }
  0xcb   :  { %v222_v44 = vmax.f32 %v176_v40, 0.0 }
  0xcc   :  { %v223_v46 = vmax.f32 %v205_v42, 0.0 }
  0xcd   :  { %v232_v47 = vpack.c.bf16 %v222_v44, %v220_v43 }
  0xce   :  { %v233_v48 = vpack.c.bf16 %v223_v46, %v221_v45 }
  0xcf   :  { %386 = vmatmul.bf16.gmra.mxu2 %v232_v47 }
  0xd0   :  { %415 = vmatmul.bf16.gmra.mxu3 %v233_v48  ;;  %v178_v49 = vpop.f32.mrf.mxu0 }
  0xd1   :  { %v207_v50 = vpop.f32.mrf.mxu1  ;;  %v179_v51 = vadd.f32 %v178_v49, %v46_v7 }
  0xd2   :  { %v208_v52 = vadd.f32 %v207_v50, %v47_v8 }
  0xd3   :  { %v224_v57 = vmax.f32 %v179_v51, 0.0 }
  0xd4   :  { %v225_v59 = vmax.f32 %v208_v52, 0.0 }
  0xd8   :  { %v180_v53 = vpop.f32.mrf.mxu0 }
  0xd9   :  { %v181_v54 = vadd.f32 %v180_v53, %v46_v7  ;;  %v209_v55 = vpop.f32.mrf.mxu1 }
  0xda   :  { %v210_v56 = vadd.f32 %v209_v55, %v47_v8 }
  0xdb   :  { %v226_v58 = vmax.f32 %v181_v54, 0.0 }
  0xdc   :  { %v227_v60 = vmax.f32 %v210_v56, 0.0 }
  0xdd   :  { %v234_v61 = vpack.c.bf16 %v226_v58, %v224_v57 }
  0xde   :  { %v235_v62 = vpack.c.bf16 %v227_v60, %v225_v59 }
  0xdf   :  { %391 = vmatmul.bf16.gmra.mxu2 %v234_v61 }
  0xe0   :  { %420 = vmatmul.bf16.gmra.mxu3 %v235_v62 }
 0x132   :  { %v377_v0 = vpop.f32.mrf.mxu2 }
 0x133   :  { %v378_v1 = vadd.f32 %v618_v63, %v377_v0  ;;  %v406_v2 = vpop.f32.mrf.mxu3 }
 0x135   :  { %v407_v3 = vadd.f32 %v406_v2, %v378_v1 }
 0x137   :  { %426 = vst [vmem:[%s840_s5] sm:$0xff] %v407_v3 }
 0x13a   :  { %v379_v4 = vpop.f32.mrf.mxu2 }
 0x13b   :  { %v380_v5 = vadd.f32 %v618_v63, %v379_v4  ;;  %v408_v6 = vpop.f32.mrf.mxu3 }
 0x13d   :  { %v409_v7 = vadd.f32 %v408_v6, %v380_v5 }
 0x13f   :  { %427 = vst [vmem:[%s840_s5 + $0x8] sm:$0xff] %v409_v7 }
 0x142   :  { %v382_v8 = vpop.f32.mrf.mxu2 }
 0x143   :  { %v383_v9 = vadd.f32 %v618_v63, %v382_v8  ;;  %v411_v10 = vpop.f32.mrf.mxu3 }
 0x145   :  { %v412_v11 = vadd.f32 %v411_v10, %v383_v9 }
 0x147   :  { %428 = vst [vmem:[%s840_s5 + $0x10] sm:$0xff] %v412_v11 }
 0x14a   :  { %v384_v12 = vpop.f32.mrf.mxu2 }
 0x14b   :  { %v385_v13 = vadd.f32 %v618_v63, %v384_v12  ;;  %v413_v14 = vpop.f32.mrf.mxu3 }
 0x14d   :  { %v414_v15 = vadd.f32 %v413_v14, %v385_v13 }
 0x14f   :  { %429 = vst [vmem:[%s840_s5 + $0x18] sm:$0xff] %v414_v15 }
 0x152   :  { %v387_v16 = vpop.f32.mrf.mxu2 }
 0x153   :  { %v388_v17 = vadd.f32 %v618_v63, %v387_v16  ;;  %v416_v18 = vpop.f32.mrf.mxu3 }
 0x155   :  { %v417_v19 = vadd.f32 %v416_v18, %v388_v17 }
 0x157   :  { %430 = vst [vmem:[%s840_s5 + $0x20] sm:$0xff] %v417_v19 }
 0x15a   :  { %v389_v20 = vpop.f32.mrf.mxu2 }
 0x15b   :  { %v390_v21 = vadd.f32 %v618_v63, %v389_v20  ;;  %v418_v22 = vpop.f32.mrf.mxu3 }
 0x15d   :  { %v419_v23 = vadd.f32 %v418_v22, %v390_v21 }
 0x15f   :  { %431 = vst [vmem:[%s840_s5 + $0x28] sm:$0xff] %v419_v23 }
 0x162   :  { %v392_v24 = vpop.f32.mrf.mxu2 }
 0x163   :  { %v393_v25 = vadd.f32 %v618_v63, %v392_v24  ;;  %v421_v26 = vpop.f32.mrf.mxu3 }
 0x165   :  { %v422_v27 = vadd.f32 %v421_v26, %v393_v25 }
 0x167   :  { %432 = vst [vmem:[%s840_s5 + $0x30] sm:$0xff] %v422_v27 }
 0x16a   :  { %v394_v28 = vpop.f32.mrf.mxu2 }
 0x16b   :  { %v395_v29 = vadd.f32 %v618_v63, %v394_v28  ;;  %v423_v30 = vpop.f32.mrf.mxu3 }
 0x16d   :  { %v424_v31 = vadd.f32 %v423_v30, %v395_v29 }
 0x16f   :  { %433 = vst [vmem:[%s840_s5 + $0x38] sm:$0xff] %v424_v31 }

</bundles_post_ra>
